<compile_context>
chip_gen: v5e
topology: v5e:2x2
jax: 0.10.0
libtpu: 0.0.40
codegen_flags: <defaults>
</compile_context>

<pallas_src>
import functools

import numpy as np
import jax
import jax.numpy as jnp
from jax.experimental import pallas as pl
from jax.experimental.pallas import tpu as pltpu

# ----------------------------- small synthetic shapes -----------------------
B = 16           # batch (real TrainingParams.batch_size = 32)
FLAT_DIM = 512   # stand-in for the flattened conv-feature size (real: 39936)
EMB_DIM = 32     # TrainingParams.embedding_dim
NUM_CLASSES = 5  # TrainingParams.num_classes
K_PROTOS = 3     # TrainingParams.k_prototypes


def _classifier_head_kernel(x_ref, wp_ref, bp_ref, w1q_ref, hp_ref, w2blk_ref,
                            pt_ref, pp_ref, valid_ref, hasv_ref, temp_ref,
                            out_ref, acc_ref, *, num_classes, k_protos,
                            emb_dim):
    C, K, D = num_classes, k_protos, emb_dim
    kr = pl.program_id(1)                       # FLAT reduction step (last axis)

    @pl.when(kr == 0)
    def _init():
        acc_ref[...] = jnp.zeros_like(acc_ref)

    # --- streaming GEMM over FLAT: bf16 operands, f32 MXU accumulation -------
    acc_ref[...] += jnp.dot(x_ref[...], wp_ref[...],
                            preferred_element_type=jnp.float32)

    # --- epilogue: full classifier tail, once per batch tile -----------------
    @pl.when(kr == pl.num_programs(1) - 1)
    def _epilogue():
        emb = acc_ref[...] + bp_ref[...]                              # [tm, D] f32

        # All (k, c) QueryAttention pre-activations in one lane-dense MXU pass:
        # w1q_ref is W1q replicated over K ([D, K*C*D]); hp_ref holds the
        # precomputed prototype-side hidden + bias ([1, K*C*D]).
        h = jnp.tanh(
            jnp.dot(emb, w1q_ref[...], preferred_element_type=jnp.float32)
            + hp_ref[...])                                            # [tm, K*C*D]

        # Second-layer scores via block-diagonal weight (bias b2 cancels in the
        # per-class softmax).
        scores = jnp.dot(h, w2blk_ref[...],
                         preferred_element_type=jnp.float32)          # [tm, K*C]

        # emb . prototype for every (k, c) — feeds the distance decomposition.
        g = jnp.dot(emb, pt_ref[...],
                    preferred_element_type=jnp.float32)                # [tm, K*C]

        # Masked softmax over the K prototypes, on contiguous [tm, C] slabs.
        neg_big = jnp.float32(-1e30)
        vmask, smask = [], []
        for p in range(K):
            vk = valid_ref[p:p + 1, :] > 0.0                           # [1, C]
            sk = scores[:, p * C:(p + 1) * C]                          # [tm, C]
            vmask.append(vk)
            smask.append(jnp.where(vk, sk, neg_big))
        m = smask[0]
        for p in range(1, K):
            m = jnp.maximum(m, smask[p])
        e = [jnp.where(vmask[p], jnp.exp(smask[p] - m), jnp.float32(0.0))
             for p in range(K)]
        denom = e[0]
        for p in range(1, K):
            denom = denom + e[p]
        inv = pl.reciprocal(jnp.maximum(denom, jnp.float32(1e-30)))    # exact
        w = [e[p] * inv for p in range(K)]                             # K x [tm, C]

        # ||emb - fp||^2 = ||emb||^2 - 2 emb.fp + ||fp||^2,
        #   emb.fp   = sum_k  w_k (emb . P_k)
        #   ||fp||^2 = sum_kk' w_k w_k' (P_k . P_k')   (precomputed Gram pp)
        # Invalid prototypes have w_k = 0, so they never contribute.
        emb_sq = jnp.sum(emb * emb, axis=-1, keepdims=True)            # [tm, 1]
        dot_fp = w[0] * g[:, 0:C]
        for p in range(1, K):
            dot_fp = dot_fp + w[p] * g[:, p * C:(p + 1) * C]
        fp_sq = jnp.zeros_like(dot_fp)
        for p in range(K):
            for q in range(K):
                fp_sq = fp_sq + (w[p] * w[q]) * pp_ref[p * K + q:p * K + q + 1, :]
        d2 = jnp.maximum(emb_sq - 2.0 * dot_fp + fp_sq, jnp.float32(0.0))
        dist = jnp.sqrt(d2)                                            # [tm, C]

        temp = temp_ref[0]                                             # SMEM scalar
        # Classes with zero valid prototypes -> dist = +inf in the reference
        # module -> logits = -inf here.
        out_ref[...] = jnp.where(hasv_ref[...] > 0.0, -dist * temp,
                                 jnp.float32(-jnp.inf))


def prepare_head_params(params, gemm_dtype=jnp.bfloat16):
    """Input-independent precompute. Call once and cache (e.g. under jax.jit);
    avoids re-doing the einsums / reshapes / bf16 weight cast every call."""
    wp, bp, protos, valid, w1q, w1p, b1, w2, b2, temp = params
    del b2  # constant shift across K -> cancels in the per-class softmax
    C, K, D = NUM_CLASSES, K_PROTOS, EMB_DIM

    wp_g = wp.astype(gemm_dtype)                                  # [FLAT, D]
    bp_f = bp.astype(jnp.float32).reshape(1, D)

    # prototype-side hidden activations hp[c,k,:] = protos[c,k] @ W1p[c] + b1[c]
    hp = jnp.einsum('ckd,cde->cke', protos, w1p) + b1[:, None, :]  # [C, K, D]
    hp_flat = jnp.transpose(hp, (1, 0, 2)).reshape(1, K * C * D)   # (k,c,d) layout

    # W1q replicated over k: w1q_rep[din, k*C*D + c*D + dout] = w1q[c, din, dout]
    w1q_rep = jnp.broadcast_to(w1q[None], (K, C, D, D))
    w1q_rep = jnp.transpose(w1q_rep, (2, 0, 1, 3)).reshape(D, K * C * D)

    # block-diagonal second-layer weight: scores[:, k*C+c] = sum_d h[...] w2[c,d]
    w2_kc = jnp.broadcast_to(w2[None], (K, C, D)).reshape(K * C, D)
    w2blk = jnp.eye(K * C, dtype=jnp.float32)[:, :, None] * w2_kc[:, None, :]
    w2blk = jnp.transpose(w2blk, (0, 2, 1)).reshape(K * C * D, K * C)

    # prototypes transposed for emb . proto, and their per-class Gram matrix
    pt = jnp.transpose(protos, (2, 1, 0)).reshape(D, K * C)        # [D, K*C]
    pp = jnp.einsum('ckd,cld->klc', protos, protos).reshape(K * K, C)

    valid_t = valid.astype(jnp.float32).T                          # [K, C]
    has_valid = (jnp.sum(valid, axis=1) > 0).astype(jnp.float32).reshape(1, C)
    temp_s = temp.reshape((1,)).astype(jnp.float32)                # SMEM scalar

    return (wp_g, bp_f, w1q_rep, hp_flat, w2blk, pt, pp, valid_t,
            has_valid, temp_s)


def cnn_encoder_forward(x, prepared, *, tm=8, tk=128,
                        gemm_dtype=jnp.bfloat16, vmem_limit_bytes=None):
    """Eval-mode CNNEncoder head: fc + KmeansPrototypicalNetworkClassifier."""
    (wp_g, bp_f, w1q_rep, hp_flat, w2blk, pt, pp, valid_t, has_valid,
     temp_s) = prepared
    C, K, D = NUM_CLASSES, K_PROTOS, EMB_DIM
    Bn, FLAT = x.shape
    assert Bn % tm == 0 and FLAT % tk == 0, "pick tm | B and tk | FLAT"

    x_g = x.astype(gemm_dtype)   # halve HBM bytes on the streamed activation

    grid = (Bn // tm, FLAT // tk)            # batch (parallel), FLAT (reduction)
    smem = pltpu.MemorySpace.SMEM

    def const_spec(shape):
        return pl.BlockSpec(shape, lambda b, kr: (0,) * len(shape))

    cost = pl.CostEstimate(
        flops=int(2 * Bn * FLAT * D
                  + 2 * Bn * D * (K * C * D)
                  + 2 * Bn * (K * C * D) * (K * C)
                  + 2 * Bn * D * (K * C)),
        transcendentals=int(Bn * (K * C * D + K * C)),
        bytes_accessed=int(Bn * FLAT * 2 + FLAT * D * 2
                           + (D * K * C * D + K * C * D * (K * C)) * 4
                           + Bn * C * 4))

    kernel = functools.partial(_classifier_head_kernel, num_classes=C,
                               k_protos=K, emb_dim=D)

    compiler_params = pltpu.CompilerParams(
        dimension_semantics=("parallel", "arbitrary"),
        vmem_limit_bytes=vmem_limit_bytes)

    return pl.pallas_call(
        kernel,
        out_shape=jax.ShapeDtypeStruct((Bn, C), jnp.float32),
        grid_spec=pltpu.PrefetchScalarGridSpec(
            num_scalar_prefetch=0,
            grid=grid,
            in_specs=[
                pl.BlockSpec((tm, tk), lambda b, kr: (b, kr)),   # x tile (bf16)
                pl.BlockSpec((tk, D), lambda b, kr: (kr, 0)),    # Wp tile (bf16)
                const_spec((1, D)),                              # bp
                const_spec((D, K * C * D)),                      # W1q replicated
                const_spec((1, K * C * D)),                      # hp (proto hidden)
                const_spec((K * C * D, K * C)),                  # block-diag w2
                const_spec((D, K * C)),                          # protos^T
                const_spec((K * K, C)),                          # proto Gram
                const_spec((K, C)),                              # valid mask
                const_spec((1, C)),                              # has_valid
                pl.BlockSpec(memory_space=smem),                 # temperature
            ],
            out_specs=pl.BlockSpec((tm, C), lambda b, kr: (b, 0)),
            scratch_shapes=[pltpu.VMEM((tm, D), jnp.float32)],   # f32 accumulator
        ),
        compiler_params=compiler_params,
        cost_estimate=cost,
    )(x_g, wp_g, bp_f, w1q_rep, hp_flat, w2blk, pt, pp, valid_t,
      has_valid, temp_s)


# ----------------------------- parameter init --------------------------------
def make_params(key):
    ks = jax.random.split(key, 8)
    lim_p = 1.0 / np.sqrt(FLAT_DIM)
    wp = jax.random.uniform(ks[0], (FLAT_DIM, EMB_DIM), jnp.float32, -lim_p, lim_p)
    bp = jax.random.uniform(ks[1], (1, EMB_DIM), jnp.float32, -lim_p, lim_p)

    # Prototype buffers: zeros/False at module init; populated during training.
    # Initialize deterministically (non-trivial) so the eval path is exercised,
    # including an empty class and a partially-filled class.
    protos = 0.5 * jax.random.normal(ks[2], (NUM_CLASSES, K_PROTOS, EMB_DIM),
                                     jnp.float32)
    valid = jnp.ones((NUM_CLASSES, K_PROTOS), jnp.float32)
    valid = valid.at[NUM_CLASSES - 1, :].set(0.0)   # no valid prototypes
    valid = valid.at[1, K_PROTOS - 1].set(0.0)      # partially filled

    lim_a = 1.0 / np.sqrt(2 * EMB_DIM)
    w1q = jax.random.uniform(ks[3], (NUM_CLASSES, EMB_DIM, EMB_DIM),
                             jnp.float32, -lim_a, lim_a)
    w1p = jax.random.uniform(ks[4], (NUM_CLASSES, EMB_DIM, EMB_DIM),
                             jnp.float32, -lim_a, lim_a)
    b1 = jax.random.uniform(ks[5], (NUM_CLASSES, EMB_DIM),
                            jnp.float32, -lim_a, lim_a)
    lim_b = 1.0 / np.sqrt(EMB_DIM)
    w2 = jax.random.uniform(ks[6], (NUM_CLASSES, EMB_DIM),
                            jnp.float32, -lim_b, lim_b)
    b2 = jax.random.uniform(ks[7], (1, NUM_CLASSES), jnp.float32, -lim_b, lim_b)

    temp = 1.25 * jnp.ones((1, 1), jnp.float32)   # trained-temperature stand-in
    return (wp, bp, protos, valid, w1q, w1p, b1, w2, b2, temp)


# ----------------------------- numpy reference (mirrors PyTorch) -------------
def reference_forward(x, params):
    wp, bp, protos, valid, w1q, w1p, b1, w2, b2, temp = [np.asarray(p) for p in params]
    x = np.asarray(x)
    emb = x @ wp + bp                                     # fc projection
    Bn = x.shape[0]
    logits = np.zeros((Bn, NUM_CLASSES), np.float32)
    for i in range(Bn):
        q = emb[i]
        for c in range(NUM_CLASSES):
            mask = valid[c] > 0
            if not mask.any():
                logits[i, c] = -np.inf
                continue
            P = protos[c]                                 # [K, D]
            scores = np.zeros((K_PROTOS,), np.float32)
            for p in range(K_PROTOS):
                h = np.tanh(q @ w1q[c] + P[p] @ w1p[c] + b1[c])
                scores[p] = h @ w2[c] + b2[0, c]
            s = np.where(mask, scores, -np.inf)
            s = s - s.max()
            e = np.exp(s) * mask
            w = e / e.sum()
            fp = w @ P
            dist = np.linalg.norm(q - fp)
            logits[i, c] = -dist * temp[0, 0]
    return logits


if __name__ == "__main__":
    key = jax.random.PRNGKey(0)
    k_x, k_p = jax.random.split(key)
    # x stands in for the flattened conv features of the CNN (mel + conv) backbone.
    x = jax.random.normal(k_x, (B, FLAT_DIM), jnp.float32)
    params = make_params(k_p)

    prepared = prepare_head_params(params)        # input-independent, cache it
    logits = cnn_encoder_forward(x, prepared, tm=8, tk=128)
    logits = jax.block_until_ready(logits)

    ref = reference_forward(x, params)
    if not np.allclose(np.asarray(logits), ref, rtol=5e-2, atol=5e-2):
        raise AssertionError("Pallas kernel disagrees with reference")

    print("KERNEL_OK")
</pallas_src>

<mosaic_0001>
module attributes {stable_mosaic.version = 11 : i64} {
  func.func @_classifier_head_kernel(%arg0: i32, %arg1: i32, %arg2: memref<8x128xbf16, #tpu.memory_space<vmem>>, %arg3: memref<128x32xbf16, #tpu.memory_space<vmem>>, %arg4: memref<1x32xf32, #tpu.memory_space<vmem>>, %arg5: memref<32x480xf32, #tpu.memory_space<vmem>>, %arg6: memref<1x480xf32, #tpu.memory_space<vmem>>, %arg7: memref<480x15xf32, #tpu.memory_space<vmem>>, %arg8: memref<32x15xf32, #tpu.memory_space<vmem>>, %arg9: memref<9x5xf32, #tpu.memory_space<vmem>>, %arg10: memref<3x5xf32, #tpu.memory_space<vmem>>, %arg11: memref<1x5xf32, #tpu.memory_space<vmem>>, %arg12: memref<1xf32, #tpu.memory_space<smem>>, %arg13: memref<8x5xf32, #tpu.memory_space<vmem>>, %arg14: memref<8x32xf32, #tpu.memory_space<vmem>>) attributes {dimension_semantics = [#tpu.dimension_semantics<parallel>, #tpu.dimension_semantics<arbitrary>], iteration_bounds = array<i64: 2, 4>, scalar_prefetch = 0 : i64, scratch_operands = 1 : i64, tpu.core_type = #tpu.core_type<tc>, window_params = [{transform_indices = @transform_0, window_bounds = array<i64: 8, 128>}, {transform_indices = @transform_1, window_bounds = array<i64: 128, 32>}, {pipeline_mode = #tpu.pipeline_mode<synchronous>, transform_indices = @transform_2, window_bounds = array<i64: 1, 32>}, {pipeline_mode = #tpu.pipeline_mode<synchronous>, transform_indices = @transform_3, window_bounds = array<i64: 32, 480>}, {pipeline_mode = #tpu.pipeline_mode<synchronous>, transform_indices = @transform_4, window_bounds = array<i64: 1, 480>}, {pipeline_mode = #tpu.pipeline_mode<synchronous>, transform_indices = @transform_5, window_bounds = array<i64: 480, 15>}, {pipeline_mode = #tpu.pipeline_mode<synchronous>, transform_indices = @transform_6, window_bounds = array<i64: 32, 15>}, {pipeline_mode = #tpu.pipeline_mode<synchronous>, transform_indices = @transform_7, window_bounds = array<i64: 9, 5>}, {pipeline_mode = #tpu.pipeline_mode<synchronous>, transform_indices = @transform_8, window_bounds = array<i64: 3, 5>}, {pipeline_mode = #tpu.pipeline_mode<synchronous>, transform_indices = @transform_9, window_bounds = array<i64: 1, 5>}, {transform_indices = @transform_10, window_bounds = array<i64: 1>}, {transform_indices = @transform_11, window_bounds = array<i64: 8, 5>}]} {
    %c0_i32 = arith.constant 0 : i32
    %0 = arith.cmpi eq, %arg1, %c0_i32 : i32
    %1 = arith.extui %0 : i1 to i32
    %c0_i32_0 = arith.constant 0 : i32
    %2 = arith.cmpi ne, %1, %c0_i32_0 : i32
    scf.if %2 {
      %cst_9 = arith.constant 0.000000e+00 : f32
      %12 = vector.broadcast %cst_9 : f32 to vector<8x32xf32>
      %c0_10 = arith.constant 0 : index
      %c0_11 = arith.constant 0 : index
      %13 = vector.load %arg14[%c0_10, %c0_11] : memref<8x32xf32, #tpu.memory_space<vmem>>, vector<8x32xf32>
      tpu.vector_store %arg14[%c0_10, %c0_11], %12 {strides = array<i32>} : memref<8x32xf32, #tpu.memory_space<vmem>>, vector<8x32xf32>,
    } else {
    }
    %c0 = arith.constant 0 : index
    %c0_1 = arith.constant 0 : index
    %3 = vector.load %arg14[%c0, %c0_1] : memref<8x32xf32, #tpu.memory_space<vmem>>, vector<8x32xf32>
    %c0_2 = arith.constant 0 : index
    %c0_3 = arith.constant 0 : index
    %4 = vector.load %arg2[%c0_2, %c0_3] : memref<8x128xbf16, #tpu.memory_space<vmem>>, vector<8x128xbf16>
    %c0_4 = arith.constant 0 : index
    %c0_5 = arith.constant 0 : index
    %5 = vector.load %arg3[%c0_4, %c0_5] : memref<128x32xbf16, #tpu.memory_space<vmem>>, vector<128x32xbf16>
    %cst = arith.constant dense<0.000000e+00> : vector<8x32xf32>
    %6 = tpu.matmul %4, %5, %cst {dimension_numbers = #tpu.dot_dimension_numbers<[1], [0], [0], [1], [0, 0, 1, 1], [], []>} : vector<8x128xbf16>, vector<128x32xbf16>, vector<8x32xf32> -> vector<8x32xf32>
    %7 = arith.addf %3, %6 : vector<8x32xf32>
    %c0_6 = arith.constant 0 : index
    %c0_7 = arith.constant 0 : index
    %8 = vector.load %arg14[%c0_6, %c0_7] : memref<8x32xf32, #tpu.memory_space<vmem>>, vector<8x32xf32>
    tpu.vector_store %arg14[%c0_6, %c0_7], %7 {strides = array<i32>} : memref<8x32xf32, #tpu.memory_space<vmem>>, vector<8x32xf32>,
    %c3_i32 = arith.constant 3 : i32
    %9 = arith.cmpi eq, %arg1, %c3_i32 : i32
    %10 = arith.extui %9 : i1 to i32
    %c0_i32_8 = arith.constant 0 : i32
    %11 = arith.cmpi ne, %10, %c0_i32_8 : i32
    scf.if %11 {
      %c0_9 = arith.constant 0 : index
      %c0_10 = arith.constant 0 : index
      %12 = vector.load %arg14[%c0_9, %c0_10] : memref<8x32xf32, #tpu.memory_space<vmem>>, vector<8x32xf32>
      %c0_11 = arith.constant 0 : index
      %c0_12 = arith.constant 0 : index
      %13 = vector.load %arg4[%c0_11, %c0_12] : memref<1x32xf32, #tpu.memory_space<vmem>>, vector<1x32xf32>
      %14 = vector.broadcast %13 : vector<1x32xf32> to vector<8x32xf32>
      %15 = arith.addf %12, %14 : vector<8x32xf32>
      %c0_13 = arith.constant 0 : index
      %c0_14 = arith.constant 0 : index
      %16 = vector.load %arg5[%c0_13, %c0_14] : memref<32x480xf32, #tpu.memory_space<vmem>>, vector<32x480xf32>
      %cst_15 = arith.constant dense<0.000000e+00> : vector<8x480xf32>
      %17 = tpu.matmul %15, %16, %cst_15 {dimension_numbers = #tpu.dot_dimension_numbers<[1], [0], [0], [1], [0, 0, 1, 1], [], []>} : vector<8x32xf32>, vector<32x480xf32>, vector<8x480xf32> -> vector<8x480xf32>
      %c0_16 = arith.constant 0 : index
      %c0_17 = arith.constant 0 : index
      %18 = vector.load %arg6[%c0_16, %c0_17] : memref<1x480xf32, #tpu.memory_space<vmem>>, vector<1x480xf32>
      %19 = vector.broadcast %18 : vector<1x480xf32> to vector<8x480xf32>
      %20 = arith.addf %17, %19 : vector<8x480xf32>
      %21 = math.tanh %20 : vector<8x480xf32>
      %c0_18 = arith.constant 0 : index
      %c0_19 = arith.constant 0 : index
      %22 = vector.load %arg7[%c0_18, %c0_19] : memref<480x15xf32, #tpu.memory_space<vmem>>, vector<480x15xf32>
      %cst_20 = arith.constant dense<0.000000e+00> : vector<8x15xf32>
      %23 = tpu.matmul %21, %22, %cst_20 {dimension_numbers = #tpu.dot_dimension_numbers<[1], [0], [0], [1], [0, 0, 1, 1], [], []>} : vector<8x480xf32>, vector<480x15xf32>, vector<8x15xf32> -> vector<8x15xf32>
      %c0_21 = arith.constant 0 : index
      %c0_22 = arith.constant 0 : index
      %24 = vector.load %arg8[%c0_21, %c0_22] : memref<32x15xf32, #tpu.memory_space<vmem>>, vector<32x15xf32>
      %cst_23 = arith.constant dense<0.000000e+00> : vector<8x15xf32>
      %25 = tpu.matmul %15, %24, %cst_23 {dimension_numbers = #tpu.dot_dimension_numbers<[1], [0], [0], [1], [0, 0, 1, 1], [], []>} : vector<8x32xf32>, vector<32x15xf32>, vector<8x15xf32> -> vector<8x15xf32>
      %c0_24 = arith.constant 0 : index
      %c0_25 = arith.constant 0 : index
      %26 = vector.load %arg10[%c0_24, %c0_25] : memref<3x5xf32, #tpu.memory_space<vmem>>, vector<1x5xf32>
      %cst_26 = arith.constant 0.000000e+00 : f32
      %27 = vector.broadcast %cst_26 : f32 to vector<1x5xf32>
      %28 = arith.cmpf ogt, %26, %27 : vector<1x5xf32>
      %29 = vector.extract_strided_slice %23 {offsets = [0, 0], sizes = [8, 5], strides = [1, 1]} : vector<8x15xf32> to vector<8x5xf32>
      %cst_27 = arith.constant -1.000000e+30 : f32
      %30 = vector.shape_cast %28 : vector<1x5xi1> to vector<1x5xi1>
      %31 = vector.broadcast %30 : vector<1x5xi1> to vector<8x5xi1>
      %32 = vector.broadcast %cst_27 : f32 to vector<8x5xf32>
      %33 = arith.select %31, %29, %32 : vector<8x5xi1>, vector<8x5xf32>
      %c1 = arith.constant 1 : index
      %c0_28 = arith.constant 0 : index
      %34 = vector.load %arg10[%c1, %c0_28] : memref<3x5xf32, #tpu.memory_space<vmem>>, vector<1x5xf32>
      %cst_29 = arith.constant 0.000000e+00 : f32
      %35 = vector.broadcast %cst_29 : f32 to vector<1x5xf32>
      %36 = arith.cmpf ogt, %34, %35 : vector<1x5xf32>
      %37 = vector.extract_strided_slice %23 {offsets = [0, 5], sizes = [8, 5], strides = [1, 1]} : vector<8x15xf32> to vector<8x5xf32>
      %cst_30 = arith.constant -1.000000e+30 : f32
      %38 = vector.shape_cast %36 : vector<1x5xi1> to vector<1x5xi1>
      %39 = vector.broadcast %38 : vector<1x5xi1> to vector<8x5xi1>
      %40 = vector.broadcast %cst_30 : f32 to vector<8x5xf32>
      %41 = arith.select %39, %37, %40 : vector<8x5xi1>, vector<8x5xf32>
      %c2 = arith.constant 2 : index
      %c0_31 = arith.constant 0 : index
      %42 = vector.load %arg10[%c2, %c0_31] : memref<3x5xf32, #tpu.memory_space<vmem>>, vector<1x5xf32>
      %cst_32 = arith.constant 0.000000e+00 : f32
      %43 = vector.broadcast %cst_32 : f32 to vector<1x5xf32>
      %44 = arith.cmpf ogt, %42, %43 : vector<1x5xf32>
      %45 = vector.extract_strided_slice %23 {offsets = [0, 10], sizes = [8, 5], strides = [1, 1]} : vector<8x15xf32> to vector<8x5xf32>
      %cst_33 = arith.constant -1.000000e+30 : f32
      %46 = vector.shape_cast %44 : vector<1x5xi1> to vector<1x5xi1>
      %47 = vector.broadcast %46 : vector<1x5xi1> to vector<8x5xi1>
      %48 = vector.broadcast %cst_33 : f32 to vector<8x5xf32>
      %49 = arith.select %47, %45, %48 : vector<8x5xi1>, vector<8x5xf32>
      %50 = arith.maximumf %33, %41 : vector<8x5xf32>
      %51 = arith.maximumf %50, %49 : vector<8x5xf32>
      %52 = arith.subf %33, %51 : vector<8x5xf32>
      %53 = math.exp %52 : vector<8x5xf32>
      %cst_34 = arith.constant 0.000000e+00 : f32
      %54 = vector.shape_cast %28 : vector<1x5xi1> to vector<1x5xi1>
      %55 = vector.broadcast %54 : vector<1x5xi1> to vector<8x5xi1>
      %56 = vector.broadcast %cst_34 : f32 to vector<8x5xf32>
      %57 = arith.select %55, %53, %56 : vector<8x5xi1>, vector<8x5xf32>
      %58 = arith.subf %41, %51 : vector<8x5xf32>
      %59 = math.exp %58 : vector<8x5xf32>
      %cst_35 = arith.constant 0.000000e+00 : f32
      %60 = vector.shape_cast %36 : vector<1x5xi1> to vector<1x5xi1>
      %61 = vector.broadcast %60 : vector<1x5xi1> to vector<8x5xi1>
      %62 = vector.broadcast %cst_35 : f32 to vector<8x5xf32>
      %63 = arith.select %61, %59, %62 : vector<8x5xi1>, vector<8x5xf32>
      %64 = arith.subf %49, %51 : vector<8x5xf32>
      %65 = math.exp %64 : vector<8x5xf32>
      %cst_36 = arith.constant 0.000000e+00 : f32
      %66 = vector.shape_cast %44 : vector<1x5xi1> to vector<1x5xi1>
      %67 = vector.broadcast %66 : vector<1x5xi1> to vector<8x5xi1>
      %68 = vector.broadcast %cst_36 : f32 to vector<8x5xf32>
      %69 = arith.select %67, %65, %68 : vector<8x5xi1>, vector<8x5xf32>
      %70 = arith.addf %57, %63 : vector<8x5xf32>
      %71 = arith.addf %70, %69 : vector<8x5xf32>
      %cst_37 = arith.constant 1.000000e-30 : f32
      %72 = vector.broadcast %cst_37 : f32 to vector<8x5xf32>
      %73 = arith.maximumf %71, %72 : vector<8x5xf32>
      %74 = tpu.reciprocal %73 : vector<8x5xf32> -> vector<8x5xf32>
      %75 = arith.mulf %57, %74 : vector<8x5xf32>
      %76 = arith.mulf %63, %74 : vector<8x5xf32>
      %77 = arith.mulf %69, %74 : vector<8x5xf32>
      %78 = arith.mulf %15, %15 : vector<8x32xf32>
      %cst_38 = arith.constant dense<0.000000e+00> : vector<8xf32>
      %79 = vector.multi_reduction <add>, %78, %cst_38 [1] : vector<8x32xf32> to vector<8xf32>
      %80 = vector.shape_cast %79 : vector<8xf32> to vector<8x1xf32>
      %81 = vector.extract_strided_slice %25 {offsets = [0, 0], sizes = [8, 5], strides = [1, 1]} : vector<8x15xf32> to vector<8x5xf32>
      %82 = arith.mulf %75, %81 : vector<8x5xf32>
      %83 = vector.extract_strided_slice %25 {offsets = [0, 5], sizes = [8, 5], strides = [1, 1]} : vector<8x15xf32> to vector<8x5xf32>
      %84 = arith.mulf %76, %83 : vector<8x5xf32>
      %85 = arith.addf %82, %84 : vector<8x5xf32>
      %86 = vector.extract_strided_slice %25 {offsets = [0, 10], sizes = [8, 5], strides = [1, 1]} : vector<8x15xf32> to vector<8x5xf32>
      %87 = arith.mulf %77, %86 : vector<8x5xf32>
      %88 = arith.addf %85, %87 : vector<8x5xf32>
      %cst_39 = arith.constant 0.000000e+00 : f32
      %89 = vector.broadcast %cst_39 : f32 to vector<8x5xf32>
      %90 = arith.mulf %75, %75 : vector<8x5xf32>
      %c0_40 = arith.constant 0 : index
      %c0_41 = arith.constant 0 : index
      %91 = vector.load %arg9[%c0_40, %c0_41] : memref<9x5xf32, #tpu.memory_space<vmem>>, vector<1x5xf32>
      %92 = vector.broadcast %91 : vector<1x5xf32> to vector<8x5xf32>
      %93 = arith.mulf %90, %92 : vector<8x5xf32>
      %94 = arith.addf %89, %93 : vector<8x5xf32>
      %95 = arith.mulf %75, %76 : vector<8x5xf32>
      %c1_42 = arith.constant 1 : index
      %c0_43 = arith.constant 0 : index
      %96 = vector.load %arg9[%c1_42, %c0_43] : memref<9x5xf32, #tpu.memory_space<vmem>>, vector<1x5xf32>
      %97 = vector.broadcast %96 : vector<1x5xf32> to vector<8x5xf32>
      %98 = arith.mulf %95, %97 : vector<8x5xf32>
      %99 = arith.addf %94, %98 : vector<8x5xf32>
      %100 = arith.mulf %75, %77 : vector<8x5xf32>
      %c2_44 = arith.constant 2 : index
      %c0_45 = arith.constant 0 : index
      %101 = vector.load %arg9[%c2_44, %c0_45] : memref<9x5xf32, #tpu.memory_space<vmem>>, vector<1x5xf32>
      %102 = vector.broadcast %101 : vector<1x5xf32> to vector<8x5xf32>
      %103 = arith.mulf %100, %102 : vector<8x5xf32>
      %104 = arith.addf %99, %103 : vector<8x5xf32>
      %105 = arith.mulf %76, %75 : vector<8x5xf32>
      %c3 = arith.constant 3 : index
      %c0_46 = arith.constant 0 : index
      %106 = vector.load %arg9[%c3, %c0_46] : memref<9x5xf32, #tpu.memory_space<vmem>>, vector<1x5xf32>
      %107 = vector.broadcast %106 : vector<1x5xf32> to vector<8x5xf32>
      %108 = arith.mulf %105, %107 : vector<8x5xf32>
      %109 = arith.addf %104, %108 : vector<8x5xf32>
      %110 = arith.mulf %76, %76 : vector<8x5xf32>
      %c4 = arith.constant 4 : index
      %c0_47 = arith.constant 0 : index
      %111 = vector.load %arg9[%c4, %c0_47] : memref<9x5xf32, #tpu.memory_space<vmem>>, vector<1x5xf32>
      %112 = vector.broadcast %111 : vector<1x5xf32> to vector<8x5xf32>
      %113 = arith.mulf %110, %112 : vector<8x5xf32>
      %114 = arith.addf %109, %113 : vector<8x5xf32>
      %115 = arith.mulf %76, %77 : vector<8x5xf32>
      %c5 = arith.constant 5 : index
      %c0_48 = arith.constant 0 : index
      %116 = vector.load %arg9[%c5, %c0_48] : memref<9x5xf32, #tpu.memory_space<vmem>>, vector<1x5xf32>
      %117 = vector.broadcast %116 : vector<1x5xf32> to vector<8x5xf32>
      %118 = arith.mulf %115, %117 : vector<8x5xf32>
      %119 = arith.addf %114, %118 : vector<8x5xf32>
      %120 = arith.mulf %77, %75 : vector<8x5xf32>
      %c6 = arith.constant 6 : index
      %c0_49 = arith.constant 0 : index
      %121 = vector.load %arg9[%c6, %c0_49] : memref<9x5xf32, #tpu.memory_space<vmem>>, vector<1x5xf32>
      %122 = vector.broadcast %121 : vector<1x5xf32> to vector<8x5xf32>
      %123 = arith.mulf %120, %122 : vector<8x5xf32>
      %124 = arith.addf %119, %123 : vector<8x5xf32>
      %125 = arith.mulf %77, %76 : vector<8x5xf32>
      %c7 = arith.constant 7 : index
      %c0_50 = arith.constant 0 : index
      %126 = vector.load %arg9[%c7, %c0_50] : memref<9x5xf32, #tpu.memory_space<vmem>>, vector<1x5xf32>
      %127 = vector.broadcast %126 : vector<1x5xf32> to vector<8x5xf32>
      %128 = arith.mulf %125, %127 : vector<8x5xf32>
      %129 = arith.addf %124, %128 : vector<8x5xf32>
      %130 = arith.mulf %77, %77 : vector<8x5xf32>
      %c8 = arith.constant 8 : index
      %c0_51 = arith.constant 0 : index
      %131 = vector.load %arg9[%c8, %c0_51] : memref<9x5xf32, #tpu.memory_space<vmem>>, vector<1x5xf32>
      %132 = vector.broadcast %131 : vector<1x5xf32> to vector<8x5xf32>
      %133 = arith.mulf %130, %132 : vector<8x5xf32>
      %134 = arith.addf %129, %133 : vector<8x5xf32>
      %cst_52 = arith.constant 2.000000e+00 : f32
      %135 = vector.broadcast %cst_52 : f32 to vector<8x5xf32>
      %136 = arith.mulf %135, %88 : vector<8x5xf32>
      %137 = vector.broadcast %80 : vector<8x1xf32> to vector<8x5xf32>
      %138 = arith.subf %137, %136 : vector<8x5xf32>
      %139 = arith.addf %138, %134 : vector<8x5xf32>
      %cst_53 = arith.constant 0.000000e+00 : f32
      %140 = vector.broadcast %cst_53 : f32 to vector<8x5xf32>
      %141 = arith.maximumf %139, %140 : vector<8x5xf32>
      %142 = math.sqrt %141 : vector<8x5xf32>
      %c0_54 = arith.constant 0 : index
      %143 = memref.load %arg12[%c0_54] : memref<1xf32, #tpu.memory_space<smem>>
      %c0_55 = arith.constant 0 : index
      %c0_56 = arith.constant 0 : index
      %144 = vector.load %arg11[%c0_55, %c0_56] : memref<1x5xf32, #tpu.memory_space<vmem>>, vector<1x5xf32>
      %cst_57 = arith.constant 0.000000e+00 : f32
      %145 = vector.broadcast %cst_57 : f32 to vector<1x5xf32>
      %146 = arith.cmpf ogt, %144, %145 : vector<1x5xf32>
      %cst_58 = arith.constant 0.000000e+00 : f32
      %147 = vector.broadcast %cst_58 : f32 to vector<8x5xf32>
      %148 = arith.subf %147, %142 : vector<8x5xf32>
      %149 = vector.broadcast %143 : f32 to vector<8x5xf32>
      %150 = arith.mulf %148, %149 : vector<8x5xf32>
      %cst_59 = arith.constant 0xFF800000 : f32
      %151 = vector.shape_cast %146 : vector<1x5xi1> to vector<1x5xi1>
      %152 = vector.broadcast %151 : vector<1x5xi1> to vector<8x5xi1>
      %153 = vector.broadcast %cst_59 : f32 to vector<8x5xf32>
      %154 = arith.select %152, %150, %153 : vector<8x5xi1>, vector<8x5xf32>
      %c0_60 = arith.constant 0 : index
      %c0_61 = arith.constant 0 : index
      %155 = vector.load %arg13[%c0_60, %c0_61] : memref<8x5xf32, #tpu.memory_space<vmem>>, vector<8x5xf32>
      tpu.vector_store %arg13[%c0_60, %c0_61], %154 {strides = array<i32>} : memref<8x5xf32, #tpu.memory_space<vmem>>, vector<8x5xf32>,
    } else {
    }
    return
  }
  func.func @transform_0(%arg0: i32, %arg1: i32) -> (i32, i32) {
    %c0_i32 = arith.constant 0 : i32
    return %arg0, %arg1 : i32, i32
  }
  func.func @transform_1(%arg0: i32, %arg1: i32) -> (i32, i32) {
    %c0_i32 = arith.constant 0 : i32
    %c0_i32_0 = arith.constant 0 : i32
    return %arg1, %c0_i32 : i32, i32
  }
  func.func @transform_2(%arg0: i32, %arg1: i32) -> (i32, i32) {
    %c0_i32 = arith.constant 0 : i32
    %c0_i32_0 = arith.constant 0 : i32
    %c0_i32_1 = arith.constant 0 : i32
    return %c0_i32, %c0_i32_0 : i32, i32
  }
  func.func @transform_3(%arg0: i32, %arg1: i32) -> (i32, i32) {
    %c0_i32 = arith.constant 0 : i32
    %c0_i32_0 = arith.constant 0 : i32
    %c0_i32_1 = arith.constant 0 : i32
    return %c0_i32, %c0_i32_0 : i32, i32
  }
  func.func @transform_4(%arg0: i32, %arg1: i32) -> (i32, i32) {
    %c0_i32 = arith.constant 0 : i32
    %c0_i32_0 = arith.constant 0 : i32
    %c0_i32_1 = arith.constant 0 : i32
    return %c0_i32, %c0_i32_0 : i32, i32
  }
  func.func @transform_5(%arg0: i32, %arg1: i32) -> (i32, i32) {
    %c0_i32 = arith.constant 0 : i32
    %c0_i32_0 = arith.constant 0 : i32
    %c0_i32_1 = arith.constant 0 : i32
    return %c0_i32, %c0_i32_0 : i32, i32
  }
  func.func @transform_6(%arg0: i32, %arg1: i32) -> (i32, i32) {
    %c0_i32 = arith.constant 0 : i32
    %c0_i32_0 = arith.constant 0 : i32
    %c0_i32_1 = arith.constant 0 : i32
    return %c0_i32, %c0_i32_0 : i32, i32
  }
  func.func @transform_7(%arg0: i32, %arg1: i32) -> (i32, i32) {
    %c0_i32 = arith.constant 0 : i32
    %c0_i32_0 = arith.constant 0 : i32
    %c0_i32_1 = arith.constant 0 : i32
    return %c0_i32, %c0_i32_0 : i32, i32
  }
  func.func @transform_8(%arg0: i32, %arg1: i32) -> (i32, i32) {
    %c0_i32 = arith.constant 0 : i32
    %c0_i32_0 = arith.constant 0 : i32
    %c0_i32_1 = arith.constant 0 : i32
    return %c0_i32, %c0_i32_0 : i32, i32
  }
  func.func @transform_9(%arg0: i32, %arg1: i32) -> (i32, i32) {
    %c0_i32 = arith.constant 0 : i32
    %c0_i32_0 = arith.constant 0 : i32
    %c0_i32_1 = arith.constant 0 : i32
    return %c0_i32, %c0_i32_0 : i32, i32
  }
  func.func @transform_10(%arg0: i32, %arg1: i32) -> i32 {
    %c0_i32 = arith.constant 0 : i32
    %c0_i32_0 = arith.constant 0 : i32
    return %c0_i32 : i32
  }
  func.func @transform_11(%arg0: i32, %arg1: i32) -> (i32, i32) {
    %c0_i32 = arith.constant 0 : i32
    %c0_i32_0 = arith.constant 0 : i32
    return %arg0, %c0_i32 : i32, i32
  }
}

</mosaic_0001>

<bundles_post_ra>
// kernel: tpu_custom_call.1
= control target key start
LH: loop header
LB: loop body
LE: loop exit
PB: predicated region body
PF: predicated region fallthrough
CT: control target
= control target key end

     0   :  { %s1276_s19 = smov 0   ;;  %s1278_s20 = smov 0   ;;  %s1674_s0 = inlined_call_operand.vmem [shape: bf16[16,512], index: 0, kind: input, shape index: {}]   ;;  %s1675_s1 = inlined_call_operand.vmem [shape: bf16[512,32], index: 1, kind: input, shape index: {}]   ;;  %s1676_s2 = inlined_call_operand.vmem [shape: f32[1,32], index: 2, kind: input, shape index: {}]   ;;  %s1677_s3 = inlined_call_operand.vmem [shape: f32[32,480], index: 3, kind: input, shape index: {}]   ;;  %s1678_s4 = inlined_call_operand.vmem [shape: f32[1,480], index: 4, kind: input, shape index: {}]   ;;  %s1679_s5 = inlined_call_operand.vmem [shape: f32[480,15], index: 5, kind: input, shape index: {}]   ;;  %s1680_s6 = inlined_call_operand.vmem [shape: f32[32,15], index: 6, kind: input, shape index: {}]   ;;  %s1681_s7 = inlined_call_operand.vmem [shape: f32[9,5], index: 7, kind: input, shape index: {}]   ;;  %s1682_s8 = inlined_call_operand.vmem [shape: f32[3,5], index: 8, kind: input, shape index: {}]   ;;  %s1683_s9 = inlined_call_operand.vmem [shape: f32[1,5], index: 9, kind: input, shape index: {}]   ;;  %s1684_s10 = inlined_call_operand.<no memory space> [shape: f32[1], index: 10, kind: input, shape index: {}]   ;;  %s1685_s11 = inlined_call_operand.vmem [shape: f32[16,5], index: 11, kind: output, shape index: {}]  }
   0x1   :  { %16 = sst [smem:[#allocation3]] %s1684_s10  ;;  %s1280_s21 = smov 0  }
   0x2   :  { %s1282_s22 = smov 0   ;;  %s1284_s23 = smov 0  }
   0x3 LB: > { %1687 = sst [smem:[#allocation4_spill]] %s1203_s22  ;;  %s31_s10 = sadd.s32 1, %s1199_s21  ;;  %s1207_s23 = sphi %s1284_s23, %s22_s23   ;;  %s1203_s22 = sphi %s1282_s22, %s1698_s22   ;;  %s1199_s21 = sphi %s1280_s21, %s1700_s21   ;;  %s1195_s20 = sphi %s1278_s20, %s1696_s20   ;;  %s1191_s19 = sphi %s1276_s19, %s1699_s19  }
   0x4   : > { %s34_s24 = sadd.s32 1, %s1203_s22  ;;  %p32_p0 = scmp.ge.s32.totalorder %s31_s10, 4 }
   0x5   : > { %p1041_p1 = scmp.ge.s32.totalorder %s1207_s23, 1  ;;  %p366_p2 = scmp.lt.s32.totalorder %s1207_s23, 9 }
   0x6   : > { %s1702_s10 = smov (%p32_p0, %s31_s10), 0  ;;  %s1704_s24 = smov (!%p32_p0, %s34_s24), %s1203_s22 }
   0x7   : > { %1688 = sst [smem:[#allocation5_spill]] %s1702_s10  ;;  %p367_p3 = pnand %p1041_p1, %p366_p2 }
   0x8   : > { %p36_p4 = scmp.ge.s32.totalorder %s1704_s24, 2  ;;  %p413_p5 = scmp.lt.s32.totalorder (!%p367_p3), %s1195_s20, 1 }
   0x9   : > { %370 = sbr.rel (%p367_p3) target bundleno = 693 (0x2b5), region = 64  ;;  %p415_p6 = scmp.lt.s32.totalorder (!%p367_p3), %s1191_s19, 3 }
   0xa   : > { %s1706_s24 = smov (%p36_p4, %s1704_s24), 0  ;;  %s1044_s25 = sshll.u32 (!%p367_p3), %s1191_s19, 4 }
   0xb   : > { %1689 = sst [smem:[#allocation6_spill]] %s1706_s24  ;;  %p422_p7 = scmp.lt.s32.totalorder (!%p367_p3), %s1044_s25, 63 }
   0xc   : > { %p1047_p8 = scmp.ne.s32.totalorder (!%p367_p3), %s1191_s19, 0 }
   0xe   : > { %s1708_s20 = smov (!%p413_p5, %s1195_s20), 1  ;;  %s1710_s25 = smov (!%p422_p7, %s1044_s25), 63 }
   0xf   : > { %s416_s26 = scalar_select %p415_p6, %s1191_s19, 3 }
  0x10   : > { %s1042_s27 = sshll.u32 %s1708_s20, 2  ;;  %s1046_s29 = sshll.u32 %s1708_s20, 3 }
  0x11   : > { %s418_s28 = sadd.s32 %s1042_s27, %s416_s26  ;;  %s1314_s14 = scalar_lea.vmem %s1685_s11, %s1046_s29 }
  0x12   : > { %s1043_s30 = sshll.u32 %s418_s28, 2  ;;  %s1045_s18 = sshll.u32 %s1710_s25, 2 }
  0x13   : > { %s420_s17 = scalar_lea.vmem %s1674_s0, %s1043_s30  ;;  %s425_s22 = scalar_lea.vmem %s1675_s1, %s1045_s18 }
  0x14   : > { %434 = sbr.rel (%p1047_p8) target bundleno = 27 (0x1b), region = 68 }
  0x19   : > { %vm435_vm0 = vcmask 261120   ;;  %v1209_v0 = vmov 0.0  }
  0x1a   : > { %436 = vst.msk [vmem:[#allocation2] sm:$0xff] %vm435_vm0, %v1209_v0 }
  0x1b PF: > { %v1096_v1 = vld [vmem:[%s425_s22 + $0x38] sm:$0xff]  ;;  %v1095_v2 = vld [vmem:[%s425_s22 + $0x30] sm:$0xff]  ;;  %v1094_v3 = vld [vmem:[%s425_s22 + $0x28] sm:$0xff]  ;;  %vm517_vm1 = vcmask 261120   ;;  %p1080_p9 = scmp.ne.s32.totalorder %s1191_s19, 3 }
  0x1c   : > { %503 = vmatpush.bf16.msra.mxu0 %v1096_v1  ;;  %v1093_v4 = vld [vmem:[%s425_s22 + $0x20] sm:$0xff]  ;;  %v1092_v5 = vld [vmem:[%s425_s22 + $0x18] sm:$0xff]  ;;  %v1091_v6 = vld [vmem:[%s425_s22 + $0x10] sm:$0xff]  ;;  %s1210_s12 = smov (!%p1080_p9), 123   ;;  %s1211_s13 = smov (!%p1080_p9), 118  }
  0x1d   : > { %v1090_v7 = vld [vmem:[%s425_s22 + $0x8] sm:$0xff]  ;;  %v1089_v8 = vld [vmem:[%s425_s22] sm:$0xff]  ;;  %s943_s26 = sld [smem:[#allocation3]] (!%p1080_p9) }
  0x1e   : > { %v438_v9 = vld [vmem:[%s420_s17] sm:$0xf] }
  0x20   : > { %504 = vmatpush.bf16.msra.mxu0 %v1095_v2 }
  0x21   : > { %v437_v10 = vld [vmem:[#allocation2] sm:$0xff] }
  0x24   : > { %505 = vmatpush.bf16.msra.mxu0 %v1094_v3 }
  0x28   : > { %506 = vmatpush.bf16.msra.mxu0 %v1093_v4 }
  0x2c   : > { %507 = vmatpush.bf16.msra.mxu0 %v1092_v5 }
  0x30   : > { %508 = vmatpush.bf16.msra.mxu0 %v1091_v6 }
  0x34   : > { %509 = vmatpush.bf16.msra.mxu0 %v1090_v7 }
  0x38   : > { %510 = vmatpush.bf16.msra.mxu0 %v1089_v8 }
  0x3b   : > { %511 = vmatmul.bf16.vlgmr.msra.gmra.mxu0 %v438_v9 }
  0xb8   : > { %v512_v11 = vpop.f32.mrf.mxu0 }
  0xb9   : > { %v516_v12 = vadd.f32 %v512_v11, %v437_v10 }
  0xbb   : > { %518 = vst.msk [vmem:[#allocation2] sm:$0xff] %vm517_vm1, %v516_v12 }
  0xbc   : > { %522 = sbr.rel (%p1080_p9) target bundleno = 693 (0x2b5), region = 72 }
  0xc0   : > { %v514_v13 = vpop.f32.mrf.mxu0 }
  0xc1   : > { %v543_v14 = vld [vmem:[%s1677_s3 + $0x70] sm:$0xff]  ;;  %v544_v16 = vld [vmem:[%s1677_s3 + $0x78] sm:$0xff]  ;;  %v1141_v22 = vld [vmem:[%s1676_s2] ss:$0 sm:$0xff]  ;;  %vm702_vm2 = vcmask 785408  }
  0xc2   : > { %v539_v15 = vld [vmem:[%s1677_s3 + $0x50] sm:$0xff]  ;;  %610 = vmatpush.msra.mxu2 %v543_v14  ;;  %630 = vmatpush.msra.mxu3 %v544_v16  ;;  %v540_v18 = vld [vmem:[%s1677_s3 + $0x58] sm:$0xff]  ;;  %v523_v20 = vld [vmem:[#allocation2] sm:$0xff] }
  0xc3   : > { %v535_v17 = vld [vmem:[%s1677_s3 + $0x30] sm:$0xff]  ;;  %v536_v19 = vld [vmem:[%s1677_s3 + $0x38] sm:$0xff]  ;;  %v541_v23 = vld [vmem:[%s1677_s3 + $0x60] sm:$0xff]  ;;  %v1361_v27 = vadd.f32 %v1141_v22, %v523_v20 }
  0xc4   : > { %611 = vmatpush.msra.mxu2 %v539_v15  ;;  %631 = vmatpush.msra.mxu3 %v540_v18  ;;  %v531_v21 = vld [vmem:[%s1677_s3 + $0x10] sm:$0xff]  ;;  %v532_v24 = vld [vmem:[%s1677_s3 + $0x18] sm:$0xff]  ;;  %v542_v25 = vld [vmem:[%s1677_s3 + $0x68] sm:$0xff] }
  0xc5   : > { %570 = vmatpush.msra.mxu0 %v541_v23  ;;  %v537_v26 = vld [vmem:[%s1677_s3 + $0x40] sm:$0xff]  ;;  %590 = vmatpush.msra.mxu1 %v542_v25  ;;  %v538_v28 = vld [vmem:[%s1677_s3 + $0x48] sm:$0xff]  ;;  %v689_v30 = vld [vmem:[%s1679_s5 + $0x178] sm:$0xff] }
  0xc6   : > { %612 = vmatpush.msra.mxu2 %v535_v17  ;;  %632 = vmatpush.msra.mxu3 %v536_v19  ;;  %v533_v29 = vld [vmem:[%s1677_s3 + $0x20] sm:$0xff]  ;;  %v534_v31 = vld [vmem:[%s1677_s3 + $0x28] sm:$0xff]  ;;  %v688_v33 = vld [vmem:[%s1679_s5 + $0x170] sm:$0xff] }
  0xc7   : > { %571 = vmatpush.msra.mxu0 %v537_v26  ;;  %v529_v32 = vld [vmem:[%s1677_s3] sm:$0xff]  ;;  %591 = vmatpush.msra.mxu1 %v538_v28  ;;  %v530_v34 = vld [vmem:[%s1677_s3 + $0x8] sm:$0xff]  ;;  %v657_v35 = vld [vmem:[%s1679_s5 + $0x78] sm:$0xff] }
  0xc8   : > { %613 = vmatpush.msra.mxu2 %v531_v21  ;;  %633 = vmatpush.msra.mxu3 %v532_v24  ;;  %v687_v36 = vld [vmem:[%s1679_s5 + $0x168] sm:$0xff]  ;;  %v673_v37 = vld [vmem:[%s1679_s5 + $0xf8] sm:$0xff]  ;;  %v656_v38 = vld [vmem:[%s1679_s5 + $0x70] sm:$0xff] }
  0xc9   : > { %1083 = vmatmul.msk.f32.vlgmr.msra.gmra.mxu2 %vm517_vm1, %v1361_v27  ;;  %1084 = vmatmul.msk.f32.vlgmr.msra.gmra.mxu3 %vm517_vm1, %v1361_v27  ;;  %v686_v39 = vld [vmem:[%s1679_s5 + $0x160] sm:$0xff]  ;;  %v701_v40 = vld [vmem:[%s1679_s5 + $0x1d8] sm:$0xff]  ;;  %v672_v41 = vld [vmem:[%s1679_s5 + $0xf0] sm:$0xff] }
  0xca   : > { %572 = vmatpush.msra.mxu0 %v533_v29  ;;  %746 = vmatpush.msrb.mxu2 %v689_v30  ;;  %v655_v42 = vld [vmem:[%s1679_s5 + $0x68] sm:$0xff]  ;;  %v685_v44 = vld [vmem:[%s1679_s5 + $0x158] sm:$0xff]  ;;  %v700_v45 = vld [vmem:[%s1679_s5 + $0x1d0] sm:$0xff] }
  0xcb   : > { %592 = vmatpush.msra.mxu1 %v534_v31  ;;  %v671_v43 = vld [vmem:[%s1679_s5 + $0xe8] sm:$0xff]  ;;  %v654_v46 = vld [vmem:[%s1679_s5 + $0x60] sm:$0xff]  ;;  %v684_v48 = vld [vmem:[%s1679_s5 + $0x150] sm:$0xff]  ;;  %770 = vmatpush.msrb.mxu3 %v701_v40 }
  0xcc   : > { %573 = vmatpush.msra.mxu0 %v529_v32  ;;  %747 = vmatpush.msrb.mxu2 %v688_v33  ;;  %v670_v47 = vld [vmem:[%s1679_s5 + $0xe0] sm:$0xff]  ;;  %v653_v49 = vld [vmem:[%s1679_s5 + $0x58] sm:$0xff]  ;;  %v683_v50 = vld [vmem:[%s1679_s5 + $0x148] sm:$0xff] }
  0xcd   : > { %1081 = vmatmul.msk.f32.vlgmr.msra.gmra.mxu0 %vm517_vm1, %v1361_v27  ;;  %593 = vmatpush.msra.mxu1 %v530_v34  ;;  %v699_v51 = vld [vmem:[%s1679_s5 + $0x1c8] sm:$0xff]  ;;  %v669_v52 = vld [vmem:[%s1679_s5 + $0xd8] sm:$0xff]  ;;  %v652_v53 = vld [vmem:[%s1679_s5 + $0x50] sm:$0xff] }
  0xce   : > { %706 = vmatpush.msrb.mxu0 %v657_v35  ;;  %1082 = vmatmul.msk.f32.vlgmr.msra.gmra.mxu1 %vm517_vm1, %v1361_v27  ;;  %v682_v54 = vld [vmem:[%s1679_s5 + $0x140] sm:$0xff]  ;;  %v697_v56 = vld [vmem:[%s1679_s5 + $0x1b8] sm:$0xff]  ;;  %v668_v57 = vld [vmem:[%s1679_s5 + $0xd0] sm:$0xff] }
  0xcf   : > { %748 = vmatpush.msrb.mxu2 %v687_v36  ;;  %726 = vmatpush.msrb.mxu1 %v673_v37  ;;  %v698_v55 = vld [vmem:[%s1679_s5 + $0x1c0] sm:$0xff]  ;;  %v651_v58 = vld [vmem:[%s1679_s5 + $0x48] sm:$0xff]  ;;  %v681_v59 = vld [vmem:[%s1679_s5 + $0x138] sm:$0xff] }
  0xd0   : > { %707 = vmatpush.msrb.mxu0 %v656_v38  ;;  %771 = vmatpush.msrb.mxu3 %v700_v45  ;;  %v696_v60 = vld [vmem:[%s1679_s5 + $0x1b0] sm:$0xff]  ;;  %v667_v61 = vld [vmem:[%s1679_s5 + $0xc8] sm:$0xff]  ;;  %v650_v62 = vld [vmem:[%s1679_s5 + $0x40] sm:$0xff] }
  0xd1   : > { %749 = vmatpush.msrb.mxu2 %v686_v39  ;;  %727 = vmatpush.msrb.mxu1 %v672_v41  ;;  %v680_v63 = vld [vmem:[%s1679_s5 + $0x130] sm:$0xff]  ;;  %v666_v0 = vld [vmem:[%s1679_s5 + $0xc0] sm:$0xff]  ;;  %v649_v1 = vld [vmem:[%s1679_s5 + $0x38] sm:$0xff] }
  0xd2   : > { %708 = vmatpush.msrb.mxu0 %v655_v42  ;;  %772 = vmatpush.msrb.mxu3 %v699_v51  ;;  %v679_v2 = vld [vmem:[%s1679_s5 + $0x128] sm:$0xff]  ;;  %v665_v3 = vld [vmem:[%s1679_s5 + $0xb8] sm:$0xff]  ;;  %v648_v4 = vld [vmem:[%s1679_s5 + $0x30] sm:$0xff]  ;;  %v869_v51 = vmul.f32 %v1361_v27, %v1361_v27 }
  0xd3   : > { %750 = vmatpush.msrb.mxu2 %v685_v44  ;;  %728 = vmatpush.msrb.mxu1 %v671_v43  ;;  %v664_v5 = vld [vmem:[%s1679_s5 + $0xb0] sm:$0xff]  ;;  %v678_v6 = vld [vmem:[%s1679_s5 + $0x120] sm:$0xff]  ;;  %v695_v7 = vld [vmem:[%s1679_s5 + $0x1a8] sm:$0xff] }
  0xd4   : > { %709 = vmatpush.msrb.mxu0 %v654_v46  ;;  %773 = vmatpush.msrb.mxu3 %v698_v55  ;;  %v647_v8 = vld [vmem:[%s1679_s5 + $0x28] sm:$0xff]  ;;  %v677_v10 = vld [vmem:[%s1679_s5 + $0x118] sm:$0xff]  ;;  %v694_v11 = vld [vmem:[%s1679_s5 + $0x1a0] sm:$0xff] }
  0xd5   : > { %751 = vmatpush.msrb.mxu2 %v684_v48  ;;  %729 = vmatpush.msrb.mxu1 %v670_v47  ;;  %v663_v9 = vld [vmem:[%s1679_s5 + $0xa8] sm:$0xff]  ;;  %v646_v12 = vld [vmem:[%s1679_s5 + $0x20] sm:$0xff]  ;;  %v676_v14 = vld [vmem:[%s1679_s5 + $0x110] sm:$0xff] }
  0xd6   : > { %710 = vmatpush.msrb.mxu0 %v653_v49  ;;  %774 = vmatpush.msrb.mxu3 %v697_v56  ;;  %v662_v13 = vld [vmem:[%s1679_s5 + $0xa0] sm:$0xff]  ;;  %v693_v15 = vld [vmem:[%s1679_s5 + $0x198] sm:$0xff]  ;;  %v675_v18 = vld [vmem:[%s1679_s5 + $0x108] sm:$0xff] }
  0xd7   : > { %752 = vmatpush.msrb.mxu2 %v683_v50  ;;  %730 = vmatpush.msrb.mxu1 %v669_v52  ;;  %v645_v16 = vld [vmem:[%s1679_s5 + $0x18] sm:$0xff]  ;;  %v692_v19 = vld [vmem:[%s1679_s5 + $0x190] sm:$0xff]  ;;  %v674_v22 = vld [vmem:[%s1679_s5 + $0x100] sm:$0xff]  ;;  %v870_v52 = vsel %vm517_vm1, %v869_v51, 0.0 }
  0xd8   : > { %711 = vmatpush.msrb.mxu0 %v652_v53  ;;  %775 = vmatpush.msrb.mxu3 %v696_v60  ;;  %v661_v17 = vld [vmem:[%s1679_s5 + $0x98] sm:$0xff]  ;;  %v644_v20 = vld [vmem:[%s1679_s5 + $0x10] sm:$0xff]  ;;  %v691_v23 = vld [vmem:[%s1679_s5 + $0x188] sm:$0xff] }
  0xd9   : > { %753 = vmatpush.msrb.mxu2 %v682_v54  ;;  %731 = vmatpush.msrb.mxu1 %v668_v57  ;;  %v660_v21 = vld [vmem:[%s1679_s5 + $0x90] sm:$0xff]  ;;  %v643_v24 = vld [vmem:[%s1679_s5 + $0x8] sm:$0xff]  ;;  %v690_v26 = vld [vmem:[%s1679_s5 + $0x180] sm:$0xff] }
  0xda   : > { %712 = vmatpush.msrb.mxu0 %v651_v58  ;;  %776 = vmatpush.msrb.mxu3 %v695_v7  ;;  %v659_v25 = vld [vmem:[%s1679_s5 + $0x88] sm:$0xff]  ;;  %v642_v28 = vld [vmem:[%s1679_s5] sm:$0xff]  ;;  %v789_v30 = vld [vmem:[%s1680_s6 + $0x18] sm:$0xff] }
  0xdb   : > { %754 = vmatpush.msrb.mxu2 %v681_v59  ;;  %732 = vmatpush.msrb.mxu1 %v667_v61  ;;  %v658_v29 = vld [vmem:[%s1679_s5 + $0x80] sm:$0xff]  ;;  %v788_v31 = vld [vmem:[%s1680_s6 + $0x10] sm:$0xff]  ;;  %v787_v32 = vld [vmem:[%s1680_s6 + $0x8] sm:$0xff] }
  0xdc   : > { %713 = vmatpush.msrb.mxu0 %v650_v62  ;;  %777 = vmatpush.msrb.mxu3 %v694_v11  ;;  %v786_v33 = vld [vmem:[%s1680_s6] sm:$0xff] }
  0xdd   : > { %755 = vmatpush.msrb.mxu2 %v680_v63  ;;  %733 = vmatpush.msrb.mxu1 %v666_v0  ;;  %v545_v34 = vld [vmem:[%s1678_s4] sm:$0xf]  ;;  %v1212_v63 = vmov 0  }
  0xde   : > { %714 = vmatpush.msrb.mxu0 %v649_v1  ;;  %778 = vmatpush.msrb.mxu3 %v693_v15  ;;  %v547_v35 = vperm.slane %v545_v34, 0  ;;  %v549_v36 = vperm.slane %v545_v34, 2  ;;  %v550_v37 = vperm.slane %v545_v34, 3  ;;  %v548_v39 = vperm.slane %v545_v34, 1  ;;  %v810_v61 = vld [vmem:[%s1682_s8] sm:$0x1] }
  0xdf   : > { %756 = vmatpush.msrb.mxu2 %v679_v2  ;;  %734 = vmatpush.msrb.mxu1 %v665_v3  ;;  %v826_v62 = vld [vmem:[%s1682_s8 + $0x2] sm:$0x1]  ;;  %vm811_vm4 = vcmp.gt.f32.partialorder %v810_v61, 0.0 }
  0xe0   : > { %715 = vmatpush.msrb.mxu0 %v648_v4  ;;  %779 = vmatpush.msrb.mxu3 %v692_v19  ;;  %vm827_vm5 = vcmp.gt.f32.partialorder %v826_v62, 0.0  ;;  %v812_v1 = vsel %vm811_vm4, 1, %v1212_v63 }
  0xe1   : > { %735 = vmatpush.msrb.mxu1 %v664_v5  ;;  %757 = vmatpush.msrb.mxu2 %v678_v6  ;;  %v828_v3 = vsel %vm827_vm5, 1, %v1212_v63  ;;  %v813_v4 = vperm.slane %v812_v1, 0  ;;  %v1147_v1 = vld [vmem:[%s1681_s7 + $0x5] ss:$0 sm:$0xff] }
  0xe2   : > { %716 = vmatpush.msrb.mxu0 %v647_v8  ;;  %780 = vmatpush.msrb.mxu3 %v691_v23  ;;  %v829_v7 = vperm.slane %v828_v3, 0  ;;  %v1149_v8 = vld [vmem:[%s1681_s7 + $0x7] ss:$0 sm:$0xff] }
  0xe3   : > { %736 = vmatpush.msrb.mxu1 %v663_v9  ;;  %758 = vmatpush.msrb.mxu2 %v677_v10  ;;  %vm1606_vm7 = vcmp.eq.s32.totalorder %v813_v4, 1  ;;  %v1148_v4 = vld [vmem:[%s1681_s7 + $0x6] ss:$0 sm:$0xff] }
  0xe4   : > { %717 = vmatpush.msrb.mxu0 %v646_v12  ;;  %781 = vmatpush.msrb.mxu3 %v690_v26  ;;  %vm1612_vm8 = vcmp.eq.s32.totalorder %v829_v7, 1 }
  0xe5   : > { %737 = vmatpush.msrb.mxu1 %v662_v13  ;;  %759 = vmatpush.msrb.mxu2 %v676_v14 }
  0xe6   : > { %718 = vmatpush.msrb.mxu0 %v645_v16  ;;  %802 = vmatpush.msra.mxu3 %v789_v30 }
  0xe7   : > { %738 = vmatpush.msrb.mxu1 %v661_v17  ;;  %760 = vmatpush.msrb.mxu2 %v675_v18 }
  0xe8   : > { %719 = vmatpush.msrb.mxu0 %v644_v20  ;;  %803 = vmatpush.msra.mxu3 %v788_v31 }
  0xe9   : > { %739 = vmatpush.msrb.mxu1 %v660_v21  ;;  %761 = vmatpush.msrb.mxu2 %v674_v22 }
  0xea   : > { %720 = vmatpush.msrb.mxu0 %v643_v24  ;;  %804 = vmatpush.msra.mxu3 %v787_v32 }
  0xeb   : > { %740 = vmatpush.msrb.mxu1 %v659_v25  ;;  %871 = vadd.xlane.f32.xlu2 %v870_v52 }
  0xec   : > { %721 = vmatpush.msrb.mxu0 %v642_v28  ;;  %805 = vmatpush.msra.mxu3 %v786_v33 }
  0xed   : > { %741 = vmatpush.msrb.mxu1 %v658_v29 }
 0x14a   : > { %v575_v38 = vpop.f32.mrf.mxu0 }
 0x14b   : > { %v576_v40 = vadd.f32 %v575_v38, %v547_v35  ;;  %v595_v45 = vpop.f32.mrf.mxu1 }
 0x14c   : > { %v615_v41 = vpop.f32.mrf.mxu2  ;;  %v635_v42 = vpop.f32.mrf.mxu3  ;;  %v596_v46 = vadd.f32 %v595_v45, %v548_v39 }
 0x14d   : > { %v616_v43 = vadd.f32 %v615_v41, %v549_v36  ;;  %v636_v44 = vadd.f32 %v635_v42, %v550_v37  ;;  %1151 = vtanh.f32 %v576_v40 }
 0x14f   : > { %1153 = vtanh.f32 %v616_v43  ;;  %v1142_v43 = vld [vmem:[%s1681_s7] ss:$0 sm:$0xff] }
 0x150   : > { %1155 = vtanh.f32 %v636_v44  ;;  %v1143_v44 = vld [vmem:[%s1681_s7 + $0x1] ss:$0 sm:$0xff] }
 0x151   : > { %1157 = vtanh.f32 %v596_v46 }
 0x153   : > { %v1152_v47 = vpop.eup %1151 }
 0x154   : > { %722 = vmatmul.f32.vlgmr.msrb.gmra.mxu0 %v1152_v47 }
 0x155   : > { %v1154_v48 = vpop.eup %1153 }
 0x156   : > { %v1156_v49 = vpop.eup %1155  ;;  %762 = vmatmul.f32.vlgmr.msrb.gmra.mxu2 %v1154_v48  ;;  %v1144_v48 = vld [vmem:[%s1681_s7 + $0x2] ss:$0 sm:$0xff] }
 0x157   : > { %v1158_v50 = vpop.eup %1157  ;;  %1085 = vmatmul.msk.f32.vlgmr.msrb.gmra.mxu3 %vm702_vm2, %v1156_v49 }
 0x158   : > { %742 = vmatmul.f32.vlgmr.msrb.gmra.mxu1 %v1158_v50 }
 0x15f   : > { %1086 = vmatmul.msk.f32.vlgmr.msra.gmra.mxu3 %vm517_vm1, %v1361_v27  ;;  %v816_v27 = vld [vmem:[%s1682_s8 + $0x1] sm:$0x1]  ;;  %vm953_vm1 = vcmask 39936  }
 0x160   : > { %vm817_vm3 = vcmp.gt.f32.partialorder %v816_v27, 0.0  ;;  %v1146_v27 = vld [vmem:[%s1681_s7 + $0x4] ss:$0 sm:$0xff] }
 0x161   : > { %v818_v0 = vsel %vm817_vm3, 1, %v1212_v63 }
 0x162   : > { %v819_v2 = vperm.slane %v818_v0, 0 }
 0x164   : > { %vm1602_vm6 = vcmp.eq.s32.totalorder %v819_v2, 1 }
 0x1d1   : > { %v723_v53 = vpop.f32.mrf.mxu0 }
 0x1d5   : > { %v743_v54 = vpop.f32.mrf.mxu1 }
 0x1d6   : > { %v744_v55 = vadd.f32 %v743_v54, %v723_v53 }
 0x1d9   : > { %v763_v56 = vpop.f32.mrf.mxu2 }
 0x1da   : > { %v764_v57 = vadd.f32 %v763_v56, %v744_v55  ;;  %v783_v58 = vpop.f32.mrf.mxu3  ;;  %v1145_v56 = vld [vmem:[%s1681_s7 + $0x3] ss:$0 sm:$0xff] }
 0x1dc   : > { %v784_v59 = vadd.f32 %v783_v58, %v764_v57 }
 0x1de   : > { %822 = vrot.lane.b32.xlu0 %v784_v59, %s1210_s12  ;;  %v815_v11 = vsel %vm1606_vm7, %v784_v59, -1e+30 }
 0x1e2   : > { %v1586_v60 = vpop.f32.mrf.mxu3 }
 0x1e3   : > { %875 = vrot.lane.b32.xlu1 %v1586_v60, %s1210_s12 }
 0x1e6   : > { %831 = vrot.lane.b32.xlu0 %v784_v59, %s1211_s13 }
 0x1eb   : > { %880 = vrot.lane.b32.xlu1 %v1586_v60, %s1211_s13 }
 0x250   : > { %v823_v5 = vpop.permute.xlu0 %822 }
 0x251   : > { %v825_v9 = vsel %vm1602_vm6, %v823_v5, -1e+30 }
 0x252   : > { %v835_v12 = vmax.f32 %v815_v11, %v825_v9 }
 0x255   : > { %v876_v40 = vpop.permute.xlu1 %875 }
 0x258   : > { %v832_v13 = vpop.permute.xlu0 %831 }
 0x259   : > { %v834_v14 = vsel %vm1612_vm8, %v832_v13, -1e+30 }
 0x25a   : > { %v836_v15 = vmax.f32 %v835_v12, %v834_v14 }
 0x25c   : > { %v837_v16 = vsub.f32 %v815_v11, %v836_v15  ;;  %v841_v17 = vsub.f32 %v825_v9, %v836_v15  ;;  %v845_v18 = vsub.f32 %v834_v14, %v836_v15  ;;  %v1150_v11 = vld [vmem:[%s1681_s7 + $0x8] ss:$0 sm:$0xff] }
 0x25d   : > { %v881_v61 = vpop.permute.xlu1 %880 }
 0x25e   : > { %v838_v19 = vmul.f32 1.442695, %v837_v16  ;;  %v842_v20 = vmul.f32 1.442695, %v841_v17  ;;  %v846_v21 = vmul.f32 1.442695, %v845_v18  ;;  %v872_v18 = vpop.xlane.xlu2 %871 }
 0x260   : > { %1159 = vpow2.f32 %v838_v19 }
 0x261   : > { %1161 = vpow2.f32 %v842_v20 }
 0x262   : > { %1163 = vpow2.f32 %v846_v21 }
 0x266   : > { %v1160_v22 = vpop.eup %1159 }
 0x267   : > { %v1162_v23 = vpop.eup %1161  ;;  %v840_v24 = vsel %vm1606_vm7, %v1160_v22, 0.0 }
 0x268   : > { %v1164_v25 = vpop.eup %1163  ;;  %v844_v26 = vsel %vm1602_vm6, %v1162_v23, 0.0 }
 0x269   : > { %v849_v28 = vadd.f32 %v844_v26, %v840_v24  ;;  %v848_v29 = vsel %vm1612_vm8, %v1164_v25, 0.0 }
 0x26b   : > { %v850_v30 = vadd.f32 %v849_v28, %v848_v29  ;;  %v944_v28 = vld [vmem:[%s1683_s9] sm:$0x1] }
 0x26c   : > { %vm945_vm13 = vcmp.gt.f32.partialorder %v944_v28, 0.0 }
 0x26d   : > { %v851_v31 = vmax.f32 %v850_v30, 1e-30 }
 0x26f   : > { %1165 = vrcp.f32 %v851_v31  ;;  %v863_v35 = vand.u32 2147483648, %v851_v31  ;;  %v861_v37 = vand.u32 2147483647, %v851_v31  ;;  %vm857_vm10 = vweird.f32 %v851_v31 }
 0x271   : > { %v864_v39 = vor.u32 1.1754944e-38, %v863_v35  ;;  %vm862_vm12 = vcmp.eq.f32.partialorder %v861_v37, 8.507059e+37 }
 0x275   : > { %v1166_v32 = vpop.eup %1165 }
 0x276   : > { %v853_v33 = vmul.f32 %v1166_v32, %v851_v31  ;;  %vm858_vm9 = vweird.f32 %v1166_v32 }
 0x277   : > { %vm859_vm11 = vmor %vm857_vm10, %vm858_vm9 }
 0x278   : > { %v854_v34 = vsub.f32 1.0, %v853_v33 }
 0x27a   : > { %v855_v36 = vmul.f32 %v1166_v32, %v854_v34 }
 0x27c   : > { %v856_v38 = vadd.f32 %v1166_v32, %v855_v36 }
 0x27e   : > { %v860_v41 = vsel %vm859_vm11, %v1166_v32, %v856_v38  ;;  %v949_v32 = vsel %vm945_vm13, 1, %v1212_v63  ;;  %v947_v38 = vstv %s943_s26 }
 0x27f   : > { %v865_v42 = vsel %vm862_vm12, %v864_v39, %v860_v41  ;;  %v950_v35 = vperm.slane %v949_v32, 0 }
 0x280   : > { %v866_v45 = vmul.f32 %v865_v42, %v840_v24  ;;  %v867_v46 = vmul.f32 %v865_v42, %v844_v26  ;;  %v868_v47 = vmul.f32 %v865_v42, %v848_v29 }
 0x281   : > { %vm951_vm0 = vcmp.eq.s32.totalorder %v950_v35, 1 }
 0x282   : > { %v885_v49 = vmul.f32 %v866_v45, %v866_v45  ;;  %v890_v50 = vmul.f32 %v867_v46, %v866_v45  ;;  %v895_v51 = vmul.f32 %v868_v47, %v866_v45  ;;  %v873_v54 = vmul.f32 %v866_v45, %v1586_v60 }
 0x283   : > { %v878_v55 = vmul.f32 %v876_v40, %v867_v46  ;;  %v904_v59 = vmul.f32 %v867_v46, %v867_v46  ;;  %v909_v2 = vmul.f32 %v868_v47, %v867_v46  ;;  %v883_v3 = vmul.f32 %v881_v61, %v868_v47 }
 0x284   : > { %v888_v52 = vmul.f32 %v1142_v43, %v885_v49  ;;  %v893_v53 = vmul.f32 %v1143_v44, %v890_v50  ;;  %v898_v58 = vmul.f32 %v1144_v48, %v895_v51  ;;  %v902_v60 = vmul.f32 %v1145_v56, %v890_v50 }
 0x285   : > { %v879_v0 = vadd.f32 %v878_v55, %v873_v54  ;;  %v907_v6 = vmul.f32 %v1146_v27, %v904_v59  ;;  %v912_v10 = vmul.f32 %v1147_v1, %v909_v2  ;;  %v916_v13 = vmul.f32 %v1148_v4, %v895_v51 }
 0x286   : > { %v894_v57 = vadd.f32 %v893_v53, %v888_v52  ;;  %v922_v14 = vmul.f32 %v868_v47, %v868_v47  ;;  %v920_v16 = vmul.f32 %v1149_v8, %v909_v2 }
 0x287   : > { %v884_v7 = vadd.f32 %v883_v3, %v879_v0 }
 0x288   : > { %v899_v62 = vadd.f32 %v898_v58, %v894_v57  ;;  %v925_v20 = vmul.f32 %v1150_v11, %v922_v14 }
 0x289   : > { %v927_v17 = vmul.f32 2.0, %v884_v7 }
 0x28a   : > { %v903_v5 = vadd.f32 %v902_v60, %v899_v62 }
 0x28b   : > { %v928_v22 = vsub.f32 %v872_v18, %v927_v17 }
 0x28c   : > { %v908_v9 = vadd.f32 %v907_v6, %v903_v5 }
 0x28e   : > { %v913_v12 = vadd.f32 %v912_v10, %v908_v9 }
 0x290   : > { %v917_v15 = vadd.f32 %v916_v13, %v913_v12 }
 0x292   : > { %v921_v19 = vadd.f32 %v920_v16, %v917_v15 }
 0x294   : > { %v926_v21 = vadd.f32 %v925_v20, %v921_v19 }
 0x296   : > { %v929_v23 = vadd.f32 %v928_v22, %v926_v21 }
 0x298   : > { %v930_v24 = vmax.f32 %v929_v23, 0.0 }
 0x29a   : > { %1167 = vrsqrt.f32 %v930_v24  ;;  %vm938_vm14 = vcmp.eq.f32.partialorder %v930_v24, inf  ;;  %v941_v36 = vand.u32 2147483648, %v930_v24  ;;  %vm940_vm15 = vcmp.eq.f32.partialorder %v930_v24, 0.0 }
 0x2a0   : > { %v1168_v25 = vpop.eup %1167 }
 0x2a1   : > { %v932_v26 = vmul.f32 %v1168_v25, %v930_v24 }
 0x2a3   : > { %v933_v29 = vmul.f32 %v1168_v25, %v932_v26 }
 0x2a5   : > { %v934_v30 = vmul.f32 0.5, %v933_v29 }
 0x2a7   : > { %v935_v31 = vsub.f32 1.5, %v934_v30 }
 0x2a9   : > { %v936_v33 = vmul.f32 %v1168_v25, %v935_v31 }
 0x2ab   : > { %v937_v34 = vmul.f32 %v936_v33, %v930_v24 }
 0x2ad   : > { %v939_v37 = vsel %vm938_vm14, %v930_v24, %v937_v34 }
 0x2ae   : > { %v942_v39 = vsel %vm940_vm15, %v941_v36, %v939_v37 }
 0x2af   : > { %v946_v40 = vsub.f32 0.0, %v942_v39 }
 0x2b1   : > { %v948_v41 = vmul.f32 %v947_v38, %v946_v40 }
 0x2b3   : > { %v952_v42 = vsel %vm951_vm0, %v948_v41, -inf }
 0x2b4   : > { %954 = vst.msk [vmem:[%s1314_s14] sm:$0xff] %vm953_vm1, %v952_v42 }
 0x2b5 PF: > { %s22_s23 = sadd.s32 1, %s1207_s23   ;;  %s1696_s20 = sld [smem:[#allocation4_spill]] }
 0x2b6   : > { %p19_p10 = scmp.ge.s32.totalorder %s22_s23, 10   ;;  %s1697_s27 = sld [smem:[#allocation5_spill]] }
 0x2b7   : > { %s1698_s22 = sld [smem:[#allocation6_spill]]  ;;  %s1699_s19 = smov %s1199_s21 }
 0x2b8   :  { %21 = sbr.rel (!%p19_p10) target bundleno = 3 (0x3), region = 105 }
 0x2bc   : > { %s1700_s21 = smov %s1697_s27 }

</bundles_post_ra>
